<compile_context>
chip_gen: v7x
topology: tpu7x:2x2x1
jax: 0.10.0
libtpu: 0.0.40
codegen_flags: <defaults>
</compile_context>

<pallas_src>
import jax
import jax.numpy as jnp
from jax.experimental import pallas as pl
from jax.experimental.pallas import tpu as pltpu

MIDDLE = 256  # middle_size in the PyTorch module


def _fused_mlp_kernel(v_ref, w1_ref, b1_ref, w2_ref, b2_ref, w3_ref, b3_ref, out_ref):
    """Single invocation computing all three independent MLP heads.

    v_ref  : (B, D)      input batch
    w1_ref : (D, 3*M)    first-layer weights of heads a/b/c concatenated along out dim
    b1_ref : (1, 3*M)
    w2_ref : (3, M, M)   second-layer weights, stacked per head
    b2_ref : (3, 1, M)
    w3_ref : (3, 1, M)   third-layer weights, transposed to row vectors
    b3_ref : (1, 3)      third-layer biases (column n = head n)
    out_ref: (B, 3)      column n = head n
    """
    # Layer 1: one wide MXU matmul (N = 768) for all three heads, single ReLU.
    h1 = jnp.dot(v_ref[...], w1_ref[...], preferred_element_type=jnp.float32)
    h1 = jnp.maximum(h1 + b1_ref[...], 0.0)                        # (B, 3M)

    # Layers 2 & 3 per head (static unrolled loop): three 256x256 MXU pushes,
    # then a lane reduction (VPU mul + XLU sum) instead of an N=1 matmul.
    for n in range(3):
        h1_n = h1[:, n * MIDDLE:(n + 1) * MIDDLE]                  # (B, M), 128-aligned slice
        h2_n = jnp.dot(h1_n, w2_ref[n], preferred_element_type=jnp.float32)
        h2_n = jnp.maximum(h2_n + b2_ref[n], 0.0)                  # (B, M)
        o_n = jnp.sum(h2_n * w3_ref[n], axis=-1, keepdims=True)    # (B, 1)
        o_n = o_n + b3_ref[:, n:n + 1]
        out_ref[:, n:n + 1] = o_n.astype(out_ref.dtype)


def onehot_predictor_independent_forward(v, params):
    """Forward pass equivalent to the PyTorch module.

    v: (B, input_size) float32
    params: dict with stacked head weights (leading axis = 3 heads a/b/c) and scalar net_d
    returns: (out_a (B,1), out_b (B,1), out_c (B,1), net_d (1,))
    """
    B, D = v.shape
    M = MIDDLE

    # Pack per-head params into the fused-kernel layout (cheap; constant-folded under jit
    # when params are static, and negligible otherwise).
    w1c = jnp.transpose(params["w1"], (1, 0, 2)).reshape(D, 3 * M)   # (D, 3M)
    b1c = jnp.transpose(params["b1"], (1, 0, 2)).reshape(1, 3 * M)   # (1, 3M)
    w2 = params["w2"]                                                # (3, M, M)
    b2 = params["b2"]                                                # (3, 1, M)
    w3t = jnp.transpose(params["w3"], (0, 2, 1))                     # (3, 1, M)
    b3c = params["b3"].reshape(1, 3)                                 # (1, 3)

    flops = 2 * B * (D * 3 * M) + 3 * (2 * B * M * M) + 3 * (2 * B * M)
    bytes_accessed = 4 * (v.size + w1c.size + b1c.size + w2.size + b2.size
                          + w3t.size + b3c.size + B * 3)

    vmem = pl.BlockSpec(memory_space=pltpu.MemorySpace.VMEM)
    out = pl.pallas_call(
        _fused_mlp_kernel,
        out_shape=jax.ShapeDtypeStruct((B, 3), jnp.float32),
        in_specs=[vmem, vmem, vmem, vmem, vmem, vmem, vmem],
        out_specs=vmem,
        cost_estimate=pl.CostEstimate(
            flops=flops, transcendentals=0, bytes_accessed=bytes_accessed),
    )(v, w1c, b1c, w2, b2, w3t, b3c)

    out_a = out[:, 0:1]
    out_b = out[:, 1:2]
    out_c = out[:, 2:3]
    return out_a, out_b, out_c, params["net_d"]


def init_params(key, input_size):
    """Deterministic synthetic parameter init (shapes match the PyTorch module)."""
    M = MIDDLE
    ks = jax.random.split(key, 7)

    def uinit(k, shape, fan_in):
        bound = 1.0 / jnp.sqrt(float(fan_in))
        return jax.random.uniform(k, shape, jnp.float32, -bound, bound)

    # stacked across the 3 heads (a, b, c); weights stored as (in, out) per head
    params = {
        "w1": uinit(ks[0], (3, input_size, M), input_size),
        "b1": uinit(ks[1], (3, 1, M), input_size),
        "w2": uinit(ks[2], (3, M, M), M),
        "b2": uinit(ks[3], (3, 1, M), M),
        "w3": uinit(ks[4], (3, M, 1), M),
        "b3": uinit(ks[5], (3, 1, 1), M),
        # net_d = torch.rand(1): uniform in [0, 1)
        "net_d": jax.random.uniform(ks[6], (1,), jnp.float32, 0.0, 1.0),
    }
    return params


def _reference_forward(v, params):
    """Pure-JAX reference for correctness checking."""
    outs = []
    for n in range(3):
        h1 = jnp.maximum(v @ params["w1"][n] + params["b1"][n], 0.0)
        h2 = jnp.maximum(h1 @ params["w2"][n] + params["b2"][n], 0.0)
        outs.append(h2 @ params["w3"][n] + params["b3"][n])
    return outs[0], outs[1], outs[2], params["net_d"]


if __name__ == "__main__":
    key = jax.random.PRNGKey(0)
    k_params, k_input = jax.random.split(key)

    B = 8
    INPUT_SIZE = 32

    params = init_params(k_params, INPUT_SIZE)
    v = jax.random.normal(k_input, (B, INPUT_SIZE), jnp.float32)

    out_a, out_b, out_c, net_d = jax.block_until_ready(
        onehot_predictor_independent_forward(v, params)
    )

    ref_a, ref_b, ref_c, ref_d = _reference_forward(v, params)

    assert out_a.shape == (B, 1) and out_b.shape == (B, 1) and out_c.shape == (B, 1)
    assert net_d.shape == (1,)
    # 1e-3 tolerance: the kernel's layer-3 is an exact f32 lane reduction while the
    # XLA reference's final dot may use TPU default (bf16-based) matmul precision.
    assert jnp.allclose(out_a, ref_a, atol=1e-3, rtol=1e-3)
    assert jnp.allclose(out_b, ref_b, atol=1e-3, rtol=1e-3)
    assert jnp.allclose(out_c, ref_c, atol=1e-3, rtol=1e-3)
    assert jnp.allclose(net_d, ref_d)

    print("KERNEL_OK")
</pallas_src>

<mosaic_0001>
module attributes {stable_mosaic.version = 11 : i64} {
  func.func @_fused_mlp_kernel(%arg0: memref<8x32xf32, #tpu.memory_space<vmem>>, %arg1: memref<32x768xf32, #tpu.memory_space<vmem>>, %arg2: memref<1x768xf32, #tpu.memory_space<vmem>>, %arg3: memref<3x256x256xf32, #tpu.memory_space<vmem>>, %arg4: memref<3x1x256xf32, #tpu.memory_space<vmem>>, %arg5: memref<3x1x256xf32, #tpu.memory_space<vmem>>, %arg6: memref<1x3xf32, #tpu.memory_space<vmem>>, %arg7: memref<8x3xf32, #tpu.memory_space<vmem>>) attributes {dimension_semantics = [], scalar_prefetch = 0 : i64, scratch_operands = 0 : i64, tpu.core_type = #tpu.core_type<tc>} {
    %c0 = arith.constant 0 : index
    %c0_0 = arith.constant 0 : index
    %0 = vector.load %arg0[%c0, %c0_0] : memref<8x32xf32, #tpu.memory_space<vmem>>, vector<8x32xf32>
    %c0_1 = arith.constant 0 : index
    %c0_2 = arith.constant 0 : index
    %1 = vector.load %arg1[%c0_1, %c0_2] : memref<32x768xf32, #tpu.memory_space<vmem>>, vector<32x768xf32>
    %cst = arith.constant dense<0.000000e+00> : vector<8x768xf32>
    %2 = tpu.matmul %0, %1, %cst {dimension_numbers = #tpu.dot_dimension_numbers<[1], [0], [0], [1], [0, 0, 1, 1], [], []>} : vector<8x32xf32>, vector<32x768xf32>, vector<8x768xf32> -> vector<8x768xf32>
    %c0_3 = arith.constant 0 : index
    %c0_4 = arith.constant 0 : index
    %3 = vector.load %arg2[%c0_3, %c0_4] : memref<1x768xf32, #tpu.memory_space<vmem>>, vector<1x768xf32>
    %4 = vector.broadcast %3 : vector<1x768xf32> to vector<8x768xf32>
    %5 = arith.addf %2, %4 : vector<8x768xf32>
    %cst_5 = arith.constant 0.000000e+00 : f32
    %6 = vector.broadcast %cst_5 : f32 to vector<8x768xf32>
    %7 = arith.maximumf %5, %6 : vector<8x768xf32>
    %8 = vector.extract_strided_slice %7 {offsets = [0, 0], sizes = [8, 256], strides = [1, 1]} : vector<8x768xf32> to vector<8x256xf32>
    %c0_6 = arith.constant 0 : index
    %c0_7 = arith.constant 0 : index
    %c0_8 = arith.constant 0 : index
    %9 = vector.load %arg3[%c0_6, %c0_7, %c0_8] : memref<3x256x256xf32, #tpu.memory_space<vmem>>, vector<1x256x256xf32>
    %10 = vector.shape_cast %9 : vector<1x256x256xf32> to vector<256x256xf32>
    %cst_9 = arith.constant dense<0.000000e+00> : vector<8x256xf32>
    %11 = tpu.matmul %8, %10, %cst_9 {dimension_numbers = #tpu.dot_dimension_numbers<[1], [0], [0], [1], [0, 0, 1, 1], [], []>} : vector<8x256xf32>, vector<256x256xf32>, vector<8x256xf32> -> vector<8x256xf32>
    %c0_10 = arith.constant 0 : index
    %c0_11 = arith.constant 0 : index
    %c0_12 = arith.constant 0 : index
    %12 = vector.load %arg4[%c0_10, %c0_11, %c0_12] : memref<3x1x256xf32, #tpu.memory_space<vmem>>, vector<1x1x256xf32>
    %13 = vector.shape_cast %12 : vector<1x1x256xf32> to vector<1x256xf32>
    %14 = vector.broadcast %13 : vector<1x256xf32> to vector<8x256xf32>
    %15 = arith.addf %11, %14 : vector<8x256xf32>
    %cst_13 = arith.constant 0.000000e+00 : f32
    %16 = vector.broadcast %cst_13 : f32 to vector<8x256xf32>
    %17 = arith.maximumf %15, %16 : vector<8x256xf32>
    %c0_14 = arith.constant 0 : index
    %c0_15 = arith.constant 0 : index
    %c0_16 = arith.constant 0 : index
    %18 = vector.load %arg5[%c0_14, %c0_15, %c0_16] : memref<3x1x256xf32, #tpu.memory_space<vmem>>, vector<1x1x256xf32>
    %19 = vector.shape_cast %18 : vector<1x1x256xf32> to vector<1x256xf32>
    %20 = vector.broadcast %19 : vector<1x256xf32> to vector<8x256xf32>
    %21 = arith.mulf %17, %20 : vector<8x256xf32>
    %cst_17 = arith.constant dense<0.000000e+00> : vector<8xf32>
    %22 = vector.multi_reduction <add>, %21, %cst_17 [1] : vector<8x256xf32> to vector<8xf32>
    %23 = vector.shape_cast %22 : vector<8xf32> to vector<8x1xf32>
    %c0_18 = arith.constant 0 : index
    %c0_19 = arith.constant 0 : index
    %24 = vector.load %arg6[%c0_18, %c0_19] : memref<1x3xf32, #tpu.memory_space<vmem>>, vector<1x1xf32>
    %25 = vector.broadcast %24 : vector<1x1xf32> to vector<8x1xf32>
    %26 = arith.addf %23, %25 : vector<8x1xf32>
    %c0_20 = arith.constant 0 : index
    %c0_21 = arith.constant 0 : index
    %27 = vector.load %arg7[%c0_20, %c0_21] : memref<8x3xf32, #tpu.memory_space<vmem>>, vector<8x1xf32>
    tpu.vector_store %arg7[%c0_20, %c0_21], %26 {strides = array<i32>} : memref<8x3xf32, #tpu.memory_space<vmem>>, vector<8x1xf32>,
    %28 = vector.extract_strided_slice %7 {offsets = [0, 256], sizes = [8, 256], strides = [1, 1]} : vector<8x768xf32> to vector<8x256xf32>
    %c1 = arith.constant 1 : index
    %c0_22 = arith.constant 0 : index
    %c0_23 = arith.constant 0 : index
    %29 = vector.load %arg3[%c1, %c0_22, %c0_23] : memref<3x256x256xf32, #tpu.memory_space<vmem>>, vector<1x256x256xf32>
    %30 = vector.shape_cast %29 : vector<1x256x256xf32> to vector<256x256xf32>
    %cst_24 = arith.constant dense<0.000000e+00> : vector<8x256xf32>
    %31 = tpu.matmul %28, %30, %cst_24 {dimension_numbers = #tpu.dot_dimension_numbers<[1], [0], [0], [1], [0, 0, 1, 1], [], []>} : vector<8x256xf32>, vector<256x256xf32>, vector<8x256xf32> -> vector<8x256xf32>
    %c1_25 = arith.constant 1 : index
    %c0_26 = arith.constant 0 : index
    %c0_27 = arith.constant 0 : index
    %32 = vector.load %arg4[%c1_25, %c0_26, %c0_27] : memref<3x1x256xf32, #tpu.memory_space<vmem>>, vector<1x1x256xf32>
    %33 = vector.shape_cast %32 : vector<1x1x256xf32> to vector<1x256xf32>
    %34 = vector.broadcast %33 : vector<1x256xf32> to vector<8x256xf32>
    %35 = arith.addf %31, %34 : vector<8x256xf32>
    %cst_28 = arith.constant 0.000000e+00 : f32
    %36 = vector.broadcast %cst_28 : f32 to vector<8x256xf32>
    %37 = arith.maximumf %35, %36 : vector<8x256xf32>
    %c1_29 = arith.constant 1 : index
    %c0_30 = arith.constant 0 : index
    %c0_31 = arith.constant 0 : index
    %38 = vector.load %arg5[%c1_29, %c0_30, %c0_31] : memref<3x1x256xf32, #tpu.memory_space<vmem>>, vector<1x1x256xf32>
    %39 = vector.shape_cast %38 : vector<1x1x256xf32> to vector<1x256xf32>
    %40 = vector.broadcast %39 : vector<1x256xf32> to vector<8x256xf32>
    %41 = arith.mulf %37, %40 : vector<8x256xf32>
    %cst_32 = arith.constant dense<0.000000e+00> : vector<8xf32>
    %42 = vector.multi_reduction <add>, %41, %cst_32 [1] : vector<8x256xf32> to vector<8xf32>
    %43 = vector.shape_cast %42 : vector<8xf32> to vector<8x1xf32>
    %c0_33 = arith.constant 0 : index
    %c1_34 = arith.constant 1 : index
    %44 = vector.load %arg6[%c0_33, %c1_34] : memref<1x3xf32, #tpu.memory_space<vmem>>, vector<1x1xf32>
    %45 = vector.broadcast %44 : vector<1x1xf32> to vector<8x1xf32>
    %46 = arith.addf %43, %45 : vector<8x1xf32>
    %c0_35 = arith.constant 0 : index
    %c1_36 = arith.constant 1 : index
    %47 = vector.load %arg7[%c0_35, %c1_36] : memref<8x3xf32, #tpu.memory_space<vmem>>, vector<8x1xf32>
    tpu.vector_store %arg7[%c0_35, %c1_36], %46 {strides = array<i32>} : memref<8x3xf32, #tpu.memory_space<vmem>>, vector<8x1xf32>,
    %48 = vector.extract_strided_slice %7 {offsets = [0, 512], sizes = [8, 256], strides = [1, 1]} : vector<8x768xf32> to vector<8x256xf32>
    %c2 = arith.constant 2 : index
    %c0_37 = arith.constant 0 : index
    %c0_38 = arith.constant 0 : index
    %49 = vector.load %arg3[%c2, %c0_37, %c0_38] : memref<3x256x256xf32, #tpu.memory_space<vmem>>, vector<1x256x256xf32>
    %50 = vector.shape_cast %49 : vector<1x256x256xf32> to vector<256x256xf32>
    %cst_39 = arith.constant dense<0.000000e+00> : vector<8x256xf32>
    %51 = tpu.matmul %48, %50, %cst_39 {dimension_numbers = #tpu.dot_dimension_numbers<[1], [0], [0], [1], [0, 0, 1, 1], [], []>} : vector<8x256xf32>, vector<256x256xf32>, vector<8x256xf32> -> vector<8x256xf32>
    %c2_40 = arith.constant 2 : index
    %c0_41 = arith.constant 0 : index
    %c0_42 = arith.constant 0 : index
    %52 = vector.load %arg4[%c2_40, %c0_41, %c0_42] : memref<3x1x256xf32, #tpu.memory_space<vmem>>, vector<1x1x256xf32>
    %53 = vector.shape_cast %52 : vector<1x1x256xf32> to vector<1x256xf32>
    %54 = vector.broadcast %53 : vector<1x256xf32> to vector<8x256xf32>
    %55 = arith.addf %51, %54 : vector<8x256xf32>
    %cst_43 = arith.constant 0.000000e+00 : f32
    %56 = vector.broadcast %cst_43 : f32 to vector<8x256xf32>
    %57 = arith.maximumf %55, %56 : vector<8x256xf32>
    %c2_44 = arith.constant 2 : index
    %c0_45 = arith.constant 0 : index
    %c0_46 = arith.constant 0 : index
    %58 = vector.load %arg5[%c2_44, %c0_45, %c0_46] : memref<3x1x256xf32, #tpu.memory_space<vmem>>, vector<1x1x256xf32>
    %59 = vector.shape_cast %58 : vector<1x1x256xf32> to vector<1x256xf32>
    %60 = vector.broadcast %59 : vector<1x256xf32> to vector<8x256xf32>
    %61 = arith.mulf %57, %60 : vector<8x256xf32>
    %cst_47 = arith.constant dense<0.000000e+00> : vector<8xf32>
    %62 = vector.multi_reduction <add>, %61, %cst_47 [1] : vector<8x256xf32> to vector<8xf32>
    %63 = vector.shape_cast %62 : vector<8xf32> to vector<8x1xf32>
    %c0_48 = arith.constant 0 : index
    %c2_49 = arith.constant 2 : index
    %64 = vector.load %arg6[%c0_48, %c2_49] : memref<1x3xf32, #tpu.memory_space<vmem>>, vector<1x1xf32>
    %65 = vector.broadcast %64 : vector<1x1xf32> to vector<8x1xf32>
    %66 = arith.addf %63, %65 : vector<8x1xf32>
    %c0_50 = arith.constant 0 : index
    %c2_51 = arith.constant 2 : index
    %67 = vector.load %arg7[%c0_50, %c2_51] : memref<8x3xf32, #tpu.memory_space<vmem>>, vector<8x1xf32>
    tpu.vector_store %arg7[%c0_50, %c2_51], %66 {strides = array<i32>} : memref<8x3xf32, #tpu.memory_space<vmem>>, vector<8x1xf32>,
    return
  }
}

</mosaic_0001>

<bundles_post_ra>
// kernel: tpu_custom_call.1
= control target key start
LH: loop header
LB: loop body
LE: loop exit
PB: predicated region body
PF: predicated region fallthrough
CT: control target
= control target key end

     0   :  { %12 = vsyncpa [#allocation3], 0  ;;  %s1354_s0 = inlined_call_operand.hbm [shape: f32[8,32], index: 0, kind: input, shape index: {}]   ;;  %s1355_s1 = inlined_call_operand.hbm [shape: f32[32,768], index: 1, kind: input, shape index: {}]   ;;  %s1356_s2 = inlined_call_operand.vmem [shape: f32[1,768], index: 2, kind: input, shape index: {}]   ;;  %s1357_s3 = inlined_call_operand.hbm [shape: f32[3,256,256], index: 3, kind: input, shape index: {}]   ;;  %s1358_s4 = inlined_call_operand.vmem [shape: f32[3,1,256], index: 4, kind: input, shape index: {}]   ;;  %s1359_s5 = inlined_call_operand.vmem [shape: f32[3,1,256], index: 5, kind: input, shape index: {}]   ;;  %s1360_s6 = inlined_call_operand.vmem [shape: f32[1,3], index: 6, kind: input, shape index: {}]   ;;  %s1361_s7 = inlined_call_operand.vmem [shape: f32[8,3], index: 7, kind: output, shape index: {}]  }
   0x1   :  { %13 = vsyncpa [#allocation5], 0  ;;  %s1189_s24 = smov [#allocation4]   ;;  %s1119_s28 = scalar_lea.hbm %s1355_s1, 3072 }
   0x2   :  { %s29_s25 = sshll.u32 %s1189_s24, 4  ;;  %p1120_p0 = scmp.ne.s32.totalorder %s1355_s1, %s1119_s28  ;;  %s30_s25 = int_to_ptr.vmem [resolvable:$true] %s29_s25 }
   0x3   :  { %p1123_p1 = scmp.lt.u32.totalorder %s1119_s28, %s1355_s1 }
   0x5   :  { %p1125_p2 = pnand %p1123_p1, %p1120_p0 }
   0x7   :  { %1128 = shalt.err (!%p1125_p2)
}
   0x8   :  { %s1129_s10 = scalar_lea.vmem %s30_s25, 3072  ;;  %p1134_p4 = scmp.lt.s32.totalorder %s30_s25, %s30_s25 }
   0x9   :  { %p1130_p3 = scmp.ne.s32.totalorder %s30_s25, %s1129_s10  ;;  %p1135_p5 = scmp.lt.s32.totalorder %s1129_s10, %s1129_s10 }
   0xb   :  { %p1136_p6 = por %p1135_p5, %p1134_p4 }
   0xd   :  { %p1137_p7 = pnand %p1136_p6, %p1130_p3 }
   0xf   :  { %1140 = shalt.err (!%p1137_p7)
}
  0x10   :  { %s1190_s11 = smov 768   ;;  %s1191_s12 = smov 48  }
  0x11   :  { %35 = dma.hbm_to_vmem [thread:$0]  %s1355_s1, 3072, %s30_s25, [#allocation5], %s1190_s11, %s1190_s11, %s1191_s12  }
  0x12   :  { %s1192_s15 = smov [#allocation2]   ;;  %s1193_s17 = smov [#allocation6]  }
  0x13   :  { %s20_s16 = sshll.u32 %s1192_s15, 4  ;;  %s43_s18 = sshll.u32 %s1193_s17, 4  ;;  %s21_s16 = int_to_ptr.vmem [resolvable:$true] %s20_s16  ;;  %s44_s18 = int_to_ptr.vmem [resolvable:$true] %s43_s18 }
  0x14   :  { %s1141_s21 = scalar_lea.hbm %s1354_s0, 128 }
  0x15   :  { %p1142_p8 = scmp.ne.s32.totalorder %s1354_s0, %s1141_s21  ;;  %p1145_p9 = scmp.lt.u32.totalorder %s1141_s21, %s1354_s0 }
  0x17   :  { %p1147_p10 = pnand %p1145_p9, %p1142_p8 }
  0x19   :  { %1150 = shalt.err (!%p1147_p10)
}
  0x1a   :  { %s1151_s1 = scalar_lea.vmem %s21_s16, 128  ;;  %p1156_p12 = scmp.lt.s32.totalorder %s21_s16, %s21_s16 }
  0x1b   :  { %p1152_p11 = scmp.ne.s32.totalorder %s21_s16, %s1151_s1  ;;  %p1157_p13 = scmp.lt.s32.totalorder %s1151_s1, %s1151_s1 }
  0x1d   :  { %p1158_p0 = por %p1157_p13, %p1156_p12 }
  0x1f   :  { %p1159_p1 = pnand %p1158_p0, %p1152_p11 }
  0x21   :  { %1162 = shalt.err (!%p1159_p1)
}
  0x22   :  { %23 = dma.hbm_to_vmem [thread:$0]  %s1354_s0, 128, %s21_s16, [#allocation3]  }
  0x23   :  { %s1163_s30 = scalar_lea.hbm %s1357_s3, 24576 }
  0x24   :  { %p1164_p2 = scmp.ne.s32.totalorder %s1357_s3, %s1163_s30  ;;  %p1167_p3 = scmp.lt.u32.totalorder %s1163_s30, %s1357_s3 }
  0x26   :  { %p1169_p4 = pnand %p1167_p3, %p1164_p2 }
  0x28   :  { %1172 = shalt.err (!%p1169_p4)
}
  0x29   :  { %s1173_s12 = scalar_lea.vmem %s44_s18, 24576  ;;  %p1178_p6 = scmp.lt.s32.totalorder %s44_s18, %s44_s18 }
  0x2a   :  { %p1174_p5 = scmp.ne.s32.totalorder %s44_s18, %s1173_s12  ;;  %p1179_p7 = scmp.lt.s32.totalorder %s1173_s12, %s1173_s12 }
  0x2c   :  { %p1180_p8 = por %p1179_p7, %p1178_p6 }
  0x2e   :  { %p1181_p9 = pnand %p1180_p8, %p1174_p5 }
  0x30   :  { %1184 = shalt.err (!%p1181_p9)
}
  0x31   :  { %s1194_s0 = smov 256   ;;  %s1195_s13 = smov 16  }
  0x32   :  { %49 = dma.hbm_to_vmem [thread:$0]  %s1357_s3, 24576, %s44_s18, [#allocation5], %s1194_s0, %s1194_s0, %s1195_s13  }
  0x33   :  { %1185 = dma.done.wait [#allocation3], 128  }
  0x34   :  { %1186 = vsyncadd [#allocation3], 4294967168 }
  0x35   :  { %1187 = dma.done.wait [#allocation5], 27648  }
  0x36   :  { %1188 = vsyncadd [#allocation5], 4294939648  ;;  %v1196_v0 = vmov 0.0   ;;  %v67_v1 = vld [vmem:[#allocation4 + $0x8] sm:$0xff]  ;;  %v73_v2 = vld [vmem:[#allocation4 + $0x38] sm:$0xff]  ;;  %vm122_vm0 = vcmask 261120  }
  0x37   :  { %190 = vmatprep.mubr.f32.mxu0 %v1196_v0  ;;  %v66_v3 = vld [vmem:[#allocation4] sm:$0xff]  ;;  %v895_v4 = vpack.c.bf16 %v73_v2, %v67_v1  ;;  %v72_v5 = vld [vmem:[#allocation4 + $0x30] sm:$0xff]  ;;  %v79_v6 = vld [vmem:[#allocation4 + $0x68] sm:$0xff]  ;;  %vm519_vm1 = vcmask 7168   ;;  %vm698_vm2 = vcmask 15368   ;;  %vm877_vm3 = vcmask 23568  }
  0x38   :  { %v85_v7 = vld [vmem:[#allocation4 + $0x98] sm:$0xff]  ;;  %v897_v8 = vpack.c.bf16 %v72_v5, %v66_v3  ;;  %v78_v10 = vld [vmem:[#allocation4 + $0x60] sm:$0xff]  ;;  %v84_v11 = vld [vmem:[#allocation4 + $0x90] sm:$0xff] }
  0x39   :  { %v899_v9 = vpack.c.bf16 %v85_v7, %v79_v6  ;;  %896 = vmatprep.subr.bf16.mxu0 %v895_v4  ;;  %v69_v12 = vld [vmem:[#allocation4 + $0x18] sm:$0xff]  ;;  %v75_v13 = vld [vmem:[#allocation4 + $0x48] sm:$0xff]  ;;  %v901_v14 = vpack.c.bf16 %v84_v11, %v78_v10  ;;  %v68_v16 = vld [vmem:[#allocation4 + $0x10] sm:$0xff] }
  0x3a   :  { %898 = vmatpush1.bf16.msra.mxu0 %v897_v8  ;;  %v903_v15 = vpack.c.bf16 %v75_v13, %v69_v12  ;;  %v74_v17 = vld [vmem:[#allocation4 + $0x40] sm:$0xff]  ;;  %v81_v18 = vld [vmem:[#allocation4 + $0x78] sm:$0xff]  ;;  %v87_v19 = vld [vmem:[#allocation4 + $0xa8] sm:$0xff] }
  0x3b   :  { %900 = vmatprep.subr.bf16.mxu0 %v899_v9  ;;  %v1274_v20 = vld [vmem:[#allocation2] sm:$0xff]  ;;  %v80_v21 = vld [vmem:[#allocation4 + $0x70] sm:$0xff]  ;;  %v86_v22 = vld [vmem:[#allocation4 + $0xa0] sm:$0xff]  ;;  %v905_v23 = vpack.c.bf16 %v74_v17, %v68_v16  ;;  %v907_v28 = vpack.c.bf16 %v87_v19, %v81_v18 }
  0x3c   :  { %v71_v24 = vld [vmem:[#allocation4 + $0x28] sm:$0xff]  ;;  %v77_v25 = vld [vmem:[#allocation4 + $0x58] sm:$0xff]  ;;  %v345_v30 = vld [vmem:[#allocation6] sm:$0xff]  ;;  %v909_v40 = vpack.c.bf16 %v86_v22, %v80_v21 }
  0x3d   :  { %v346_v26 = vld [vmem:[#allocation6 + $0x8] sm:$0xff]  ;;  %v348_v27 = vld [vmem:[#allocation6 + $0x18] sm:$0xff]  ;;  %v347_v31 = vld [vmem:[#allocation6 + $0x10] sm:$0xff]  ;;  %v911_v41 = vpack.c.bf16 %v77_v25, %v71_v24 }
  0x3e   :  { %902 = vmatpush1.bf16.msra.mxu0 %v901_v14  ;;  %v919_v29 = vpack.c.bf16 %v348_v27, %v346_v26  ;;  %v350_v32 = vld [vmem:[#allocation6 + $0x28] sm:$0xff]  ;;  %v921_v33 = vpack.c.bf16 %v347_v31, %v345_v30  ;;  %v352_v34 = vld [vmem:[#allocation6 + $0x38] sm:$0xff]  ;;  %v349_v35 = vld [vmem:[#allocation6 + $0x20] sm:$0xff] }
  0x3f   :  { %904 = vmatprep.subr.bf16.mxu0 %v903_v15  ;;  %v351_v36 = vld [vmem:[#allocation6 + $0x30] sm:$0xff]  ;;  %v923_v37 = vpack.c.bf16 %v352_v34, %v350_v32  ;;  %v354_v38 = vld [vmem:[#allocation6 + $0x48] sm:$0xff]  ;;  %v356_v39 = vld [vmem:[#allocation6 + $0x58] sm:$0xff] }
  0x40   :  { %920 = vmatprep.subr.bf16.mxu1 %v919_v29  ;;  %v70_v42 = vld [vmem:[#allocation4 + $0x20] sm:$0xff]  ;;  %v76_v43 = vld [vmem:[#allocation4 + $0x50] sm:$0xff]  ;;  %v83_v44 = vld [vmem:[#allocation4 + $0x88] sm:$0xff]  ;;  %v925_v45 = vpack.c.bf16 %v351_v36, %v349_v35  ;;  %v927_v47 = vpack.c.bf16 %v356_v39, %v354_v38 }
  0x41   :  { %885 = vmatmul.mubr.msk.f32.vlgmr.msra.gmra.mrb[0].mxu0 %vm122_vm0, %v1274_v20  ;;  %922 = vmatpush1.bf16.msra.mxu1 %v921_v33  ;;  %v89_v46 = vld [vmem:[#allocation4 + $0xb8] sm:$0xff]  ;;  %v353_v48 = vld [vmem:[#allocation6 + $0x40] sm:$0xff]  ;;  %v355_v49 = vld [vmem:[#allocation6 + $0x50] sm:$0xff]  ;;  %v913_v52 = vpack.c.bf16 %v76_v43, %v70_v42 }
  0x42   :  { %906 = vmatpush1.bf16.msra.mxu0 %v905_v23  ;;  %261 = vmatprep.mubr.f32.mxu0 %v1196_v0  ;;  %v358_v50 = vld [vmem:[#allocation6 + $0x68] sm:$0xff]  ;;  %v360_v51 = vld [vmem:[#allocation6 + $0x78] sm:$0xff]  ;;  %v915_v53 = vpack.c.bf16 %v89_v46, %v83_v44  ;;  %v82_v54 = vld [vmem:[#allocation4 + $0x80] sm:$0xff]  ;;  %v929_v56 = vpack.c.bf16 %v355_v49, %v353_v48 }
  0x43   :  { %908 = vmatprep.subr.bf16.mxu0 %v907_v28  ;;  %924 = vmatprep.subr.bf16.mxu1 %v923_v37  ;;  %v88_v55 = vld [vmem:[#allocation4 + $0xb0] sm:$0xff]  ;;  %v931_v57 = vpack.c.bf16 %v360_v51, %v358_v50  ;;  %v357_v58 = vld [vmem:[#allocation6 + $0x60] sm:$0xff]  ;;  %v362_v60 = vld [vmem:[#allocation6 + $0x88] sm:$0xff] }
  0x44   :  { %v359_v59 = vld [vmem:[#allocation6 + $0x70] sm:$0xff]  ;;  %v364_v61 = vld [vmem:[#allocation6 + $0x98] sm:$0xff]  ;;  %v917_v62 = vpack.c.bf16 %v88_v55, %v82_v54  ;;  %v361_v2 = vld [vmem:[#allocation6 + $0x80] sm:$0xff] }
  0x45   :  { %926 = vmatpush1.bf16.msra.mxu1 %v925_v45  ;;  %v933_v63 = vpack.c.bf16 %v359_v59, %v357_v58  ;;  %v935_v1 = vpack.c.bf16 %v364_v61, %v362_v60  ;;  %v363_v3 = vld [vmem:[#allocation6 + $0x90] sm:$0xff]  ;;  %v366_v4 = vld [vmem:[#allocation6 + $0xa8] sm:$0xff]  ;;  %v368_v5 = vld [vmem:[#allocation6 + $0xb8] sm:$0xff] }
  0x46   :  { %910 = vmatpush1.bf16.msra.mxu0 %v909_v40  ;;  %928 = vmatprep.subr.bf16.mxu1 %v927_v47  ;;  %v937_v6 = vpack.c.bf16 %v363_v3, %v361_v2  ;;  %v365_v7 = vld [vmem:[#allocation6 + $0xa0] sm:$0xff]  ;;  %v939_v8 = vpack.c.bf16 %v368_v5, %v366_v4  ;;  %v367_v9 = vld [vmem:[#allocation6 + $0xb0] sm:$0xff]  ;;  %v370_v10 = vld [vmem:[#allocation6 + $0xc8] sm:$0xff] }
  0x47   :  { %912 = vmatprep.subr.bf16.mxu0 %v911_v41  ;;  %v372_v11 = vld [vmem:[#allocation6 + $0xd8] sm:$0xff]  ;;  %v522_v13 = vld [vmem:[#allocation6 + $0x200] sm:$0xff]  ;;  %v524_v15 = vld [vmem:[#allocation6 + $0x210] sm:$0xff]  ;;  %v941_v16 = vpack.c.bf16 %v367_v9, %v365_v7 }
  0x48   :  { %v525_v12 = vld [vmem:[#allocation6 + $0x218] sm:$0xff]  ;;  %v985_v17 = vpack.c.bf16 %v524_v15, %v522_v13  ;;  %v943_v18 = vpack.c.bf16 %v372_v11, %v370_v10  ;;  %v369_v19 = vld [vmem:[#allocation6 + $0xc0] sm:$0xff]  ;;  %v371_v21 = vld [vmem:[#allocation6 + $0xd0] sm:$0xff] }
  0x49   :  { %886 = vmatmul.mubr.msk.f32.vlgmr.msra.gmra.mrb[2].mxu0 %vm122_vm0, %v1274_v20  ;;  %930 = vmatpush1.bf16.msra.mxu1 %v929_v56  ;;  %v374_v22 = vld [vmem:[#allocation6 + $0xe8] sm:$0xff]  ;;  %v376_v23 = vld [vmem:[#allocation6 + $0xf8] sm:$0xff]  ;;  %v945_v24 = vpack.c.bf16 %v371_v21, %v369_v19  ;;  %v373_v25 = vld [vmem:[#allocation6 + $0xe0] sm:$0xff] }
  0x4a   :  { %914 = vmatpush1.bf16.msra.mxu0 %v913_v52  ;;  %332 = vmatprep.mubr.f32.mxu0 %v1196_v0  ;;  %v523_v0 = vld [vmem:[#allocation6 + $0x208] sm:$0xff]  ;;  %v375_v26 = vld [vmem:[#allocation6 + $0xf0] sm:$0xff]  ;;  %v380_v28 = vld [vmem:[#allocation6 + $0x118] sm:$0xff] }
  0x4b   :  { %916 = vmatprep.subr.bf16.mxu0 %v915_v53  ;;  %932 = vmatprep.subr.bf16.mxu1 %v931_v57  ;;  %v983_v14 = vpack.c.bf16 %v525_v12, %v523_v0  ;;  %v378_v27 = vld [vmem:[#allocation6 + $0x108] sm:$0xff]  ;;  %v949_v29 = vpack.c.bf16 %v375_v26, %v373_v25  ;;  %v377_v31 = vld [vmem:[#allocation6 + $0x100] sm:$0xff]  ;;  %v379_v32 = vld [vmem:[#allocation6 + $0x110] sm:$0xff] }
  0x4c   :  { %v951_v30 = vpack.c.bf16 %v380_v28, %v378_v27  ;;  %v382_v33 = vld [vmem:[#allocation6 + $0x128] sm:$0xff]  ;;  %v384_v34 = vld [vmem:[#allocation6 + $0x138] sm:$0xff]  ;;  %v953_v35 = vpack.c.bf16 %v379_v32, %v377_v31  ;;  %v381_v37 = vld [vmem:[#allocation6 + $0x120] sm:$0xff] }
  0x4d   :  { %934 = vmatpush1.bf16.msra.mxu1 %v933_v63  ;;  %v955_v36 = vpack.c.bf16 %v384_v34, %v382_v33  ;;  %v383_v38 = vld [vmem:[#allocation6 + $0x130] sm:$0xff]  ;;  %v386_v39 = vld [vmem:[#allocation6 + $0x148] sm:$0xff]  ;;  %v388_v40 = vld [vmem:[#allocation6 + $0x158] sm:$0xff] }
  0x4e   :  { %918 = vmatpush1.bf16.msra.mxu0 %v917_v62  ;;  %936 = vmatprep.subr.bf16.mxu1 %v935_v1  ;;  %v957_v41 = vpack.c.bf16 %v383_v38, %v381_v37  ;;  %v959_v42 = vpack.c.bf16 %v388_v40, %v386_v39  ;;  %v385_v43 = vld [vmem:[#allocation6 + $0x140] sm:$0xff]  ;;  %v387_v44 = vld [vmem:[#allocation6 + $0x150] sm:$0xff]  ;;  %v390_v45 = vld [vmem:[#allocation6 + $0x168] sm:$0xff] }
  0x4f   :  { %984 = vmatprep.subr.bf16.mxu0 %v983_v14  ;;  %v392_v46 = vld [vmem:[#allocation6 + $0x178] sm:$0xff]  ;;  %v961_v47 = vpack.c.bf16 %v387_v44, %v385_v43  ;;  %v389_v49 = vld [vmem:[#allocation6 + $0x160] sm:$0xff]  ;;  %v391_v50 = vld [vmem:[#allocation6 + $0x170] sm:$0xff] }
  0x50   :  { %v963_v48 = vpack.c.bf16 %v392_v46, %v390_v45  ;;  %v394_v51 = vld [vmem:[#allocation6 + $0x188] sm:$0xff]  ;;  %v396_v52 = vld [vmem:[#allocation6 + $0x198] sm:$0xff]  ;;  %v965_v53 = vpack.c.bf16 %v391_v50, %v389_v49  ;;  %v393_v55 = vld [vmem:[#allocation6 + $0x180] sm:$0xff] }
  0x51   :  { %887 = vmatmul.mubr.msk.f32.vlgmr.msra.gmra.mrb[4].mxu0 %vm122_vm0, %v1274_v20  ;;  %938 = vmatpush1.bf16.msra.mxu1 %v937_v6  ;;  %v947_v20 = vpack.c.bf16 %v376_v23, %v374_v22  ;;  %v967_v54 = vpack.c.bf16 %v396_v52, %v394_v51  ;;  %v395_v56 = vld [vmem:[#allocation6 + $0x190] sm:$0xff]  ;;  %v398_v57 = vld [vmem:[#allocation6 + $0x1a8] sm:$0xff]  ;;  %v400_v58 = vld [vmem:[#allocation6 + $0x1b8] sm:$0xff] }
  0x52   :  { %940 = vmatprep.subr.bf16.mxu1 %v939_v8  ;;  %986 = vmatpush1.bf16.msra.mxu0 %v985_v17  ;;  %v969_v59 = vpack.c.bf16 %v395_v56, %v393_v55  ;;  %v971_v60 = vpack.c.bf16 %v400_v58, %v398_v57  ;;  %v397_v61 = vld [vmem:[#allocation6 + $0x1a0] sm:$0xff]  ;;  %v399_v62 = vld [vmem:[#allocation6 + $0x1b0] sm:$0xff]  ;;  %v402_v63 = vld [vmem:[#allocation6 + $0x1c8] sm:$0xff] }
  0x53   :  { %v404_v1 = vld [vmem:[#allocation6 + $0x1d8] sm:$0xff]  ;;  %v973_v2 = vpack.c.bf16 %v399_v62, %v397_v61  ;;  %v401_v4 = vld [vmem:[#allocation6 + $0x1c0] sm:$0xff]  ;;  %v403_v5 = vld [vmem:[#allocation6 + $0x1d0] sm:$0xff] }
  0x54   :  { %v975_v3 = vpack.c.bf16 %v404_v1, %v402_v63  ;;  %v977_v6 = vpack.c.bf16 %v403_v5, %v401_v4  ;;  %v527_v7 = vld [vmem:[#allocation6 + $0x228] sm:$0xff]  ;;  %v529_v8 = vld [vmem:[#allocation6 + $0x238] sm:$0xff]  ;;  %v526_v10 = vld [vmem:[#allocation6 + $0x220] sm:$0xff] }
  0x55   :  { %942 = vmatpush1.bf16.msra.mxu1 %v941_v16  ;;  %v987_v9 = vpack.c.bf16 %v529_v8, %v527_v7  ;;  %v528_v11 = vld [vmem:[#allocation6 + $0x230] sm:$0xff]  ;;  %v406_v12 = vld [vmem:[#allocation6 + $0x1e8] sm:$0xff]  ;;  %v408_v13 = vld [vmem:[#allocation6 + $0x1f8] sm:$0xff] }
  0x56   :  { %944 = vmatprep.subr.bf16.mxu1 %v943_v18  ;;  %v989_v0 = vpack.c.bf16 %v528_v11, %v526_v10  ;;  %v979_v14 = vpack.c.bf16 %v408_v13, %v406_v12  ;;  %v405_v15 = vld [vmem:[#allocation6 + $0x1e0] sm:$0xff]  ;;  %v407_v16 = vld [vmem:[#allocation6 + $0x1f0] sm:$0xff]  ;;  %v531_v18 = vld [vmem:[#allocation6 + $0x248] sm:$0xff] }
  0x57   :  { %988 = vmatprep.subr.bf16.mxu0 %v987_v9  ;;  %v981_v17 = vpack.c.bf16 %v407_v16, %v405_v15  ;;  %v533_v19 = vld [vmem:[#allocation6 + $0x258] sm:$0xff]  ;;  %v530_v22 = vld [vmem:[#allocation6 + $0x240] sm:$0xff]  ;;  %v532_v23 = vld [vmem:[#allocation6 + $0x250] sm:$0xff] }
  0x58   :  { %990 = vmatpush1.bf16.msra.mxu0 %v989_v0  ;;  %v991_v21 = vpack.c.bf16 %v533_v19, %v531_v18  ;;  %v704_v25 = vld [vmem:[#allocation6 + $0x418] sm:$0xff]  ;;  %v535_v27 = vld [vmem:[#allocation6 + $0x268] sm:$0xff]  ;;  %v536_v31 = vld [vmem:[#allocation6 + $0x270] sm:$0xff] }
  0x59   :  { %946 = vmatpush1.bf16.msra.mxu1 %v945_v24  ;;  %v993_v24 = vpack.c.bf16 %v532_v23, %v530_v22  ;;  %v537_v28 = vld [vmem:[#allocation6 + $0x278] sm:$0xff]  ;;  %v539_v33 = vld [vmem:[#allocation6 + $0x288] sm:$0xff]  ;;  %v540_v37 = vld [vmem:[#allocation6 + $0x290] sm:$0xff] }
  0x5a   :  { %948 = vmatprep.subr.bf16.mxu1 %v947_v20  ;;  %v702_v20 = vld [vmem:[#allocation6 + $0x408] sm:$0xff]  ;;  %992 = vmatprep.subr.bf16.mxu0 %v991_v21  ;;  %v541_v34 = vld [vmem:[#allocation6 + $0x298] sm:$0xff]  ;;  %v544_v43 = vld [vmem:[#allocation6 + $0x2b0] sm:$0xff] }
  0x5b   :  { %v1047_v26 = vpack.c.bf16 %v704_v25, %v702_v20  ;;  %v543_v39 = vld [vmem:[#allocation6 + $0x2a8] sm:$0xff]  ;;  %v545_v40 = vld [vmem:[#allocation6 + $0x2b8] sm:$0xff]  ;;  %v548_v49 = vld [vmem:[#allocation6 + $0x2d0] sm:$0xff] }
  0x5c   :  { %994 = vmatpush1.bf16.msra.mxu0 %v993_v24  ;;  %v547_v45 = vld [vmem:[#allocation6 + $0x2c8] sm:$0xff]  ;;  %v549_v46 = vld [vmem:[#allocation6 + $0x2d8] sm:$0xff]  ;;  %v552_v55 = vld [vmem:[#allocation6 + $0x2f0] sm:$0xff] }
  0x5d   :  { %950 = vmatpush1.bf16.msra.mxu1 %v949_v29  ;;  %v995_v29 = vpack.c.bf16 %v537_v28, %v535_v27  ;;  %v551_v51 = vld [vmem:[#allocation6 + $0x2e8] sm:$0xff]  ;;  %v553_v52 = vld [vmem:[#allocation6 + $0x2f8] sm:$0xff]  ;;  %v556_v61 = vld [vmem:[#allocation6 + $0x310] sm:$0xff] }
  0x5e   :  { %952 = vmatprep.subr.bf16.mxu1 %v951_v30  ;;  %v534_v30 = vld [vmem:[#allocation6 + $0x260] sm:$0xff]  ;;  %v555_v57 = vld [vmem:[#allocation6 + $0x308] sm:$0xff]  ;;  %v557_v58 = vld [vmem:[#allocation6 + $0x318] sm:$0xff] }
  0x5f   :  { %v997_v32 = vpack.c.bf16 %v536_v31, %v534_v30  ;;  %996 = vmatprep.subr.bf16.mxu0 %v995_v29  ;;  %v559_v63 = vld [vmem:[#allocation6 + $0x328] sm:$0xff]  ;;  %v561_v1 = vld [vmem:[#allocation6 + $0x338] sm:$0xff]  ;;  %v560_v4 = vld [vmem:[#allocation6 + $0x330] sm:$0xff] }
  0x60   :  { %v565_v7 = vld [vmem:[#allocation6 + $0x358] sm:$0xff]  ;;  %v562_v9 = vld [vmem:[#allocation6 + $0x340] sm:$0xff]  ;;  %v564_v10 = vld [vmem:[#allocation6 + $0x350] sm:$0xff] }
  0x61   :  { %954 = vmatpush1.bf16.msra.mxu1 %v953_v35  ;;  %998 = vmatpush1.bf16.msra.mxu0 %v997_v32  ;;  %v999_v35 = vpack.c.bf16 %v541_v34, %v539_v33  ;;  %v1025_v11 = vpack.c.bf16 %v564_v10, %v562_v9  ;;  %v567_v0 = vld [vmem:[#allocation6 + $0x368] sm:$0xff]  ;;  %v569_v12 = vld [vmem:[#allocation6 + $0x378] sm:$0xff]  ;;  %v568_v15 = vld [vmem:[#allocation6 + $0x370] sm:$0xff] }
  0x62   :  { %956 = vmatprep.subr.bf16.mxu1 %v955_v36  ;;  %v538_v36 = vld [vmem:[#allocation6 + $0x280] sm:$0xff]  ;;  %v1027_v13 = vpack.c.bf16 %v569_v12, %v567_v0  ;;  %v573_v18 = vld [vmem:[#allocation6 + $0x398] sm:$0xff]  ;;  %v572_v22 = vld [vmem:[#allocation6 + $0x390] sm:$0xff] }
  0x63   :  { %v1001_v38 = vpack.c.bf16 %v540_v37, %v538_v36  ;;  %1000 = vmatprep.subr.bf16.mxu0 %v999_v35  ;;  %v570_v21 = vld [vmem:[#allocation6 + $0x380] sm:$0xff]  ;;  %v575_v24 = vld [vmem:[#allocation6 + $0x3a8] sm:$0xff]  ;;  %v577_v20 = vld [vmem:[#allocation6 + $0x3b8] sm:$0xff] }
  0x64   :  { %v1033_v23 = vpack.c.bf16 %v572_v22, %v570_v21  ;;  %v1035_v25 = vpack.c.bf16 %v577_v20, %v575_v24  ;;  %v576_v27 = vld [vmem:[#allocation6 + $0x3b0] sm:$0xff]  ;;  %v579_v29 = vld [vmem:[#allocation6 + $0x3c8] sm:$0xff]  ;;  %v581_v30 = vld [vmem:[#allocation6 + $0x3d8] sm:$0xff] }
  0x65   :  { %958 = vmatpush1.bf16.msra.mxu1 %v957_v41  ;;  %1002 = vmatpush1.bf16.msra.mxu0 %v1001_v38  ;;  %v1003_v41 = vpack.c.bf16 %v545_v40, %v543_v39  ;;  %v1039_v31 = vpack.c.bf16 %v581_v30, %v579_v29  ;;  %v578_v32 = vld [vmem:[#allocation6 + $0x3c0] sm:$0xff]  ;;  %v580_v33 = vld [vmem:[#allocation6 + $0x3d0] sm:$0xff]  ;;  %v583_v35 = vld [vmem:[#allocation6 + $0x3e8] sm:$0xff] }
  0x66   :  { %960 = vmatprep.subr.bf16.mxu1 %v959_v42  ;;  %v542_v42 = vld [vmem:[#allocation6 + $0x2a0] sm:$0xff]  ;;  %v1041_v34 = vpack.c.bf16 %v580_v33, %v578_v32  ;;  %v585_v36 = vld [vmem:[#allocation6 + $0x3f8] sm:$0xff]  ;;  %v584_v39 = vld [vmem:[#allocation6 + $0x3f0] sm:$0xff] }
  0x67   :  { %v1005_v44 = vpack.c.bf16 %v544_v43, %v542_v42  ;;  %1004 = vmatprep.subr.bf16.mxu0 %v1003_v41  ;;  %v1043_v37 = vpack.c.bf16 %v585_v36, %v583_v35  ;;  %v582_v38 = vld [vmem:[#allocation6 + $0x3e0] sm:$0xff]  ;;  %v92_v41 = vlaneseq  ;;  %v711_v9 = vld [vmem:[#allocation6 + $0x450] sm:$0xff]  ;;  %v714_v0 = vld [vmem:[#allocation6 + $0x468] sm:$0xff] }
  0x68   :  { %v1045_v40 = vpack.c.bf16 %v584_v39, %v582_v38  ;;  %v716_v12 = vld [vmem:[#allocation6 + $0x478] sm:$0xff]  ;;  %v715_v21 = vld [vmem:[#allocation6 + $0x470] sm:$0xff]  ;;  %v718_v22 = vld [vmem:[#allocation6 + $0x488] sm:$0xff] }
  0x69   :  { %962 = vmatpush1.bf16.msra.mxu1 %v961_v47  ;;  %1006 = vmatpush1.bf16.msra.mxu0 %v1005_v44  ;;  %v1007_v47 = vpack.c.bf16 %v549_v46, %v547_v45  ;;  %v1284_v42 = vshrl.u32 %v92_v41, 7  ;;  %v1292_v44 = vld [vmem:[%s1356_s2] sm:$0x3f]  ;;  %v722_v30 = vld [vmem:[#allocation6 + $0x4a8] sm:$0xff]  ;;  %v721_v36 = vld [vmem:[#allocation6 + $0x4a0] sm:$0xff] }
  0x6a   :  { %964 = vmatprep.subr.bf16.mxu1 %v963_v48  ;;  %v546_v48 = vld [vmem:[#allocation6 + $0x2c0] sm:$0xff]  ;;  %v726_v38 = vld [vmem:[#allocation6 + $0x4c8] sm:$0xff]  ;;  %v728_v39 = vld [vmem:[#allocation6 + $0x4d8] sm:$0xff] }
  0x6b   :  { %v1009_v50 = vpack.c.bf16 %v548_v49, %v546_v48  ;;  %1008 = vmatprep.subr.bf16.mxu0 %v1007_v47  ;;  %v1287_v43 = vsub.s32 0, %v1284_v42  ;;  %v1295_v45 = vsub.s32 1, %v1284_v42  ;;  %v1071_v41 = vpack.c.bf16 %v728_v39, %v726_v38  ;;  %v761_v39 = vld [vmem:[#allocation6 + $0x5e0] sm:$0xff] }
  0x6d   :  { %966 = vmatpush1.bf16.msra.mxu1 %v965_v53  ;;  %1010 = vmatpush1.bf16.msra.mxu0 %v1009_v50  ;;  %v1011_v53 = vpack.c.bf16 %v553_v52, %v551_v51  ;;  %v95_v46 = vrot.slane %v1292_v44, %v1287_v43  ;;  %v99_v47 = vrot.slane %v1292_v44, %v1295_v45  ;;  %v701_v51 = vld [vmem:[#allocation6 + $0x400] sm:$0xff]  ;;  %v703_v52 = vld [vmem:[#allocation6 + $0x410] sm:$0xff] }
  0x6e   :  { %968 = vmatprep.subr.bf16.mxu1 %v967_v54  ;;  %v550_v54 = vld [vmem:[#allocation6 + $0x2e0] sm:$0xff] }
  0x6f   :  { %v1013_v56 = vpack.c.bf16 %v552_v55, %v550_v54  ;;  %1012 = vmatprep.subr.bf16.mxu0 %v1011_v53  ;;  %v102_v53 = vsub.s32 2, %v1284_v42  ;;  %v706_v55 = vld [vmem:[#allocation6 + $0x428] sm:$0xff] }
  0x71   :  { %970 = vmatpush1.bf16.msra.mxu1 %v969_v59  ;;  %1014 = vmatpush1.bf16.msra.mxu0 %v1013_v56  ;;  %v1015_v59 = vpack.c.bf16 %v557_v58, %v555_v57  ;;  %v708_v56 = vld [vmem:[#allocation6 + $0x438] sm:$0xff]  ;;  %v106_v57 = vsub.s32 3, %v1284_v42 }
  0x72   :  { %972 = vmatprep.subr.bf16.mxu1 %v971_v60  ;;  %v554_v60 = vld [vmem:[#allocation6 + $0x300] sm:$0xff] }
  0x73   :  { %v1017_v62 = vpack.c.bf16 %v556_v61, %v554_v60  ;;  %1016 = vmatprep.subr.bf16.mxu0 %v1015_v59  ;;  %v1049_v59 = vpack.c.bf16 %v703_v52, %v701_v51  ;;  %v1051_v61 = vpack.c.bf16 %v708_v56, %v706_v55  ;;  %v729_v52 = vld [vmem:[#allocation6 + $0x4e0] sm:$0xff]  ;;  %v736_v55 = vld [vmem:[#allocation6 + $0x518] sm:$0xff] }
  0x75   :  { %974 = vmatpush1.bf16.msra.mxu1 %v973_v2  ;;  %1018 = vmatpush1.bf16.msra.mxu0 %v1017_v62  ;;  %v1019_v2 = vpack.c.bf16 %v561_v1, %v559_v63  ;;  %v705_v62 = vld [vmem:[#allocation6 + $0x420] sm:$0xff]  ;;  %v707_v63 = vld [vmem:[#allocation6 + $0x430] sm:$0xff]  ;;  %v103_v1 = vrot.slane %v1292_v44, %v102_v53 }
  0x76   :  { %976 = vmatprep.subr.bf16.mxu1 %v975_v3  ;;  %v558_v3 = vld [vmem:[#allocation6 + $0x320] sm:$0xff]  ;;  %v731_v53 = vld [vmem:[#allocation6 + $0x4f0] sm:$0xff] }
  0x77   :  { %v1021_v5 = vpack.c.bf16 %v560_v4, %v558_v3  ;;  %1020 = vmatprep.subr.bf16.mxu0 %v1019_v2  ;;  %v710_v2 = vld [vmem:[#allocation6 + $0x448] sm:$0xff]  ;;  %v712_v3 = vld [vmem:[#allocation6 + $0x458] sm:$0xff]  ;;  %v107_v4 = vrot.slane %v1292_v44, %v106_v57  ;;  %v1077_v56 = vpack.c.bf16 %v731_v53, %v729_v52 }
  0x79   :  { %978 = vmatpush1.bf16.msra.mxu1 %v977_v6  ;;  %1022 = vmatpush1.bf16.msra.mxu0 %v1021_v5  ;;  %v563_v6 = vld [vmem:[#allocation6 + $0x348] sm:$0xff]  ;;  %v1053_v5 = vpack.c.bf16 %v707_v63, %v705_v62 }
  0x7a   :  { %980 = vmatprep.subr.bf16.mxu1 %v979_v14  ;;  %v1023_v8 = vpack.c.bf16 %v565_v7, %v563_v6  ;;  %v566_v14 = vld [vmem:[#allocation6 + $0x360] sm:$0xff]  ;;  %v1055_v7 = vpack.c.bf16 %v712_v3, %v710_v2  ;;  %v739_v2 = vld [vmem:[#allocation6 + $0x530] sm:$0xff]  ;;  %v742_v3 = vld [vmem:[#allocation6 + $0x548] sm:$0xff] }
  0x7b   :  { %v1029_v16 = vpack.c.bf16 %v568_v15, %v566_v14  ;;  %v114_v14 = vsub.s32 5, %v1284_v42 }
  0x7c   :  { %1024 = vmatprep.subr.bf16.mxu0 %v1023_v8  ;;  %v709_v8 = vld [vmem:[#allocation6 + $0x440] sm:$0xff] }
  0x7d   :  { %982 = vmatpush1.bf16.msra.mxu1 %v981_v17  ;;  %1026 = vmatpush1.bf16.msra.mxu0 %v1025_v11  ;;  %v571_v17 = vld [vmem:[#allocation6 + $0x388] sm:$0xff]  ;;  %v115_v24 = vrot.slane %v1292_v44, %v114_v14 }
  0x7e   :  { %1048 = vmatprep.subr.bf16.mxu1 %v1047_v26  ;;  %1028 = vmatprep.subr.bf16.mxu0 %v1027_v13  ;;  %v1031_v19 = vpack.c.bf16 %v573_v18, %v571_v17  ;;  %v574_v26 = vld [vmem:[#allocation6 + $0x3a0] sm:$0xff]  ;;  %v1059_v18 = vpack.c.bf16 %v716_v12, %v714_v0  ;;  %v750_v14 = vld [vmem:[#allocation6 + $0x588] sm:$0xff] }
  0x7f   :  { %v1037_v28 = vpack.c.bf16 %v576_v27, %v574_v26  ;;  %v717_v27 = vld [vmem:[#allocation6 + $0x480] sm:$0xff] }
  0x80   :  { %v745_v12 = vld [vmem:[#allocation6 + $0x560] sm:$0xff] }
  0x81   :  { %1030 = vmatpush1.bf16.msra.mxu0 %v1029_v16  ;;  %v1057_v16 = vpack.c.bf16 %v711_v9, %v709_v8  ;;  %v743_v8 = vld [vmem:[#allocation6 + $0x550] sm:$0xff]  ;;  %v746_v9 = vld [vmem:[#allocation6 + $0x568] sm:$0xff] }
  0x82   :  { %1032 = vmatprep.subr.bf16.mxu0 %v1031_v19  ;;  %v713_v19 = vld [vmem:[#allocation6 + $0x460] sm:$0xff] }
  0x83   :  { %v1061_v20 = vpack.c.bf16 %v715_v21, %v713_v19  ;;  %v751_v19 = vld [vmem:[#allocation6 + $0x590] sm:$0xff]  ;;  %v754_v21 = vld [vmem:[#allocation6 + $0x5a8] sm:$0xff] }
  0x85   :  { %1034 = vmatpush1.bf16.msra.mxu0 %v1033_v23  ;;  %v720_v23 = vld [vmem:[#allocation6 + $0x498] sm:$0xff] }
  0x86   :  { %1036 = vmatprep.subr.bf16.mxu0 %v1035_v25  ;;  %v1063_v26 = vpack.c.bf16 %v720_v23, %v718_v22  ;;  %v756_v22 = vld [vmem:[#allocation6 + $0x5b8] sm:$0xff] }
  0x89   :  { %1038 = vmatpush1.bf16.msra.mxu0 %v1037_v28  ;;  %v719_v28 = vld [vmem:[#allocation6 + $0x490] sm:$0xff] }
  0x8a   :  { %1040 = vmatprep.subr.bf16.mxu0 %v1039_v31  ;;  %v724_v31 = vld [vmem:[#allocation6 + $0x4b8] sm:$0xff]  ;;  %v1065_v33 = vpack.c.bf16 %v719_v28, %v717_v27  ;;  %v758_v27 = vld [vmem:[#allocation6 + $0x5c8] sm:$0xff] }
  0x8b   :  { %v1067_v35 = vpack.c.bf16 %v724_v31, %v722_v30  ;;  %v760_v28 = vld [vmem:[#allocation6 + $0x5d8] sm:$0xff]  ;;  %v110_v30 = vsub.s32 4, %v1284_v42 }
  0x8c   :  { %v1103_v31 = vpack.c.bf16 %v760_v28, %v758_v27  ;;  %v888_v27 = vld [vmem:[%s1360_s6] ss:$0 sm:$0xff] }
  0x8d   :  { %1042 = vmatpush1.bf16.msra.mxu0 %v1041_v34 }
  0x8e   :  { %1044 = vmatprep.subr.bf16.mxu0 %v1043_v37  ;;  %v723_v37 = vld [vmem:[#allocation6 + $0x4b0] sm:$0xff] }
  0x91   :  { %1046 = vmatpush1.bf16.msra.mxu0 %v1045_v40  ;;  %v1069_v40 = vpack.c.bf16 %v723_v37, %v721_v36  ;;  %v111_v37 = vrot.slane %v1292_v44, %v110_v30 }
 0x114   :  { %v192_v48 = vpop.f32.mrb[0].mxu0 }
 0x115   :  { %v193_v49 = vadd.f32 %v192_v48, %v95_v46  ;;  %v194_v50 = vpop.f32.mrb[1].mxu0  ;;  %v725_v46 = vld [vmem:[#allocation6 + $0x4c0] sm:$0xff]  ;;  %v730_v48 = vld [vmem:[#allocation6 + $0x4e8] sm:$0xff] }
 0x116   :  { %v195_v54 = vadd.f32 %v194_v50, %v99_v47  ;;  %v727_v47 = vld [vmem:[#allocation6 + $0x4d0] sm:$0xff] }
 0x117   :  { %v339_v60 = vmax.f32 %v193_v49, 0.0  ;;  %v732_v49 = vld [vmem:[#allocation6 + $0x4f8] sm:$0xff]  ;;  %v1073_v50 = vpack.c.bf16 %v727_v47, %v725_v46 }
 0x118   :  { %v340_v58 = vmax.f32 %v195_v54, 0.0  ;;  %v1075_v51 = vpack.c.bf16 %v732_v49, %v730_v48  ;;  %v734_v54 = vld [vmem:[#allocation6 + $0x508] sm:$0xff]  ;;  %v409_v47 = vld [vmem:[%s1358_s4] sm:$0x3] }
 0x119   :  { %v1079_v57 = vpack.c.bf16 %v736_v55, %v734_v54  ;;  %v414_v48 = vrot.slane %v409_v47, %v1287_v43  ;;  %v418_v44 = vrot.slane %v409_v47, %v1295_v45  ;;  %v494_v49 = vld [vmem:[%s1359_s5] sm:$0x3]  ;;  %v889_v55 = vld [vmem:[%s1358_s4 + $0x2] sm:$0x3] }
 0x11a   :  { %485 = vmatprep.mubr.f32.mxu1 %v340_v58  ;;  %v733_v58 = vld [vmem:[#allocation6 + $0x500] sm:$0xff]  ;;  %v503_v54 = vrot.slane %v494_v49, %v1295_v45 }
 0x11b   :  { %486 = vmatmul.mubr.f32.vlgmr.msra.gmra.mrb[0].mxu1 %v339_v60  ;;  %v738_v60 = vld [vmem:[#allocation6 + $0x528] sm:$0xff] }
 0x11c   :  { %1050 = vmatpush1.bf16.msra.mxu1 %v1049_v59  ;;  %v263_v6 = vpop.f32.mrb[2].mxu0  ;;  %v735_v59 = vld [vmem:[#allocation6 + $0x510] sm:$0xff] }
 0x11d   :  { %1052 = vmatprep.subr.bf16.mxu1 %v1051_v61  ;;  %v264_v10 = vadd.f32 %v263_v6, %v103_v1  ;;  %v265_v11 = vpop.f32.mrb[3].mxu0  ;;  %v740_v61 = vld [vmem:[#allocation6 + $0x538] sm:$0xff]  ;;  %v1081_v62 = vpack.c.bf16 %v735_v59, %v733_v58  ;;  %v737_v1 = vld [vmem:[#allocation6 + $0x520] sm:$0xff]  ;;  %v592_v59 = vrot.slane %v889_v55, %v1287_v43 }
 0x11e   :  { %v266_v13 = vadd.f32 %v265_v11, %v107_v4  ;;  %v1083_v63 = vpack.c.bf16 %v740_v61, %v738_v60  ;;  %v744_v4 = vld [vmem:[#allocation6 + $0x558] sm:$0xff] }
 0x11f   :  { %v341_v15 = vmax.f32 %v264_v10, 0.0  ;;  %v1087_v6 = vpack.c.bf16 %v744_v4, %v742_v3  ;;  %v748_v10 = vld [vmem:[#allocation6 + $0x578] sm:$0xff] }
 0x120   :  { %1054 = vmatpush1.bf16.msra.mxu1 %v1053_v5  ;;  %v342_v17 = vmax.f32 %v266_v13, 0.0  ;;  %v1085_v5 = vpack.c.bf16 %v739_v2, %v737_v1  ;;  %v1091_v0 = vpack.c.bf16 %v748_v10, %v746_v9  ;;  %v747_v13 = vld [vmem:[#allocation6 + $0x570] sm:$0xff]  ;;  %v890_v61 = vld [vmem:[%s1359_s5 + $0x2] sm:$0x3] }
 0x121   :  { %1056 = vmatprep.subr.bf16.mxu1 %v1055_v7  ;;  %v741_v7 = vld [vmem:[#allocation6 + $0x540] sm:$0xff]  ;;  %v678_v3 = vrot.slane %v890_v61, %v1287_v43 }
 0x122   :  { %663 = vmatprep.mubr.f32.mxu0 %v342_v17  ;;  %v1089_v11 = vpack.c.bf16 %v743_v8, %v741_v7 }
 0x123   :  { %664 = vmatmul.mubr.f32.vlgmr.msra.gmra.mrb[6].mxu0 %v341_v15  ;;  %v752_v15 = vld [vmem:[#allocation6 + $0x598] sm:$0xff] }
 0x124   :  { %1058 = vmatpush1.bf16.msra.mxu1 %v1057_v16  ;;  %v1307_v25 = vpop.f32.mrb[4].mxu0  ;;  %v1093_v16 = vpack.c.bf16 %v747_v13, %v745_v12  ;;  %v1095_v17 = vpack.c.bf16 %v752_v15, %v750_v14  ;;  %v893_v14 = vld [vmem:[%s1359_s5 + $0x4] sm:$0x3] }
 0x125   :  { %1060 = vmatprep.subr.bf16.mxu1 %v1059_v18  ;;  %v336_v29 = vpop.f32.mrb[5].mxu0  ;;  %v749_v18 = vld [vmem:[#allocation6 + $0x580] sm:$0xff]  ;;  %v335_v46 = vadd.f32 %v1307_v25, %v111_v37  ;;  %v499_v25 = vrot.slane %v494_v49, %v1287_v43 }
 0x126   :  { %v337_v32 = vadd.f32 %v336_v29, %v115_v24  ;;  %v1097_v23 = vpack.c.bf16 %v751_v19, %v749_v18  ;;  %v1099_v24 = vpack.c.bf16 %v756_v22, %v754_v21  ;;  %v857_v18 = vrot.slane %v893_v14, %v1287_v43 }
 0x127   :  { %v343_v42 = vmax.f32 %v335_v46, 0.0  ;;  %v861_v21 = vrot.slane %v893_v14, %v1295_v45 }
 0x128   :  { %1062 = vmatpush1.bf16.msra.mxu1 %v1061_v20  ;;  %v344_v34 = vmax.f32 %v337_v32, 0.0  ;;  %v753_v20 = vld [vmem:[#allocation6 + $0x5a0] sm:$0xff] }
 0x129   :  { %1064 = vmatprep.subr.bf16.mxu1 %v1063_v26  ;;  %v755_v26 = vld [vmem:[#allocation6 + $0x5b0] sm:$0xff]  ;;  %v757_v32 = vld [vmem:[#allocation6 + $0x5c0] sm:$0xff] }
 0x12a   :  { %842 = vmatprep.mubr.f32.mxu1 %v344_v34  ;;  %v1101_v29 = vpack.c.bf16 %v755_v26, %v753_v20  ;;  %v762_v34 = vld [vmem:[#allocation6 + $0x5e8] sm:$0xff] }
 0x12c   :  { %1066 = vmatpush1.bf16.msra.mxu1 %v1065_v33  ;;  %v759_v33 = vld [vmem:[#allocation6 + $0x5d0] sm:$0xff] }
 0x12d   :  { %1068 = vmatprep.subr.bf16.mxu1 %v1067_v35  ;;  %v764_v35 = vld [vmem:[#allocation6 + $0x5f8] sm:$0xff]  ;;  %v1105_v36 = vpack.c.bf16 %v759_v33, %v757_v32 }
 0x12e   :  { %v1107_v38 = vpack.c.bf16 %v764_v35, %v762_v34 }
 0x130   :  { %1070 = vmatpush1.bf16.msra.mxu1 %v1069_v40  ;;  %v763_v40 = vld [vmem:[#allocation6 + $0x5f0] sm:$0xff] }
 0x131   :  { %1072 = vmatprep.subr.bf16.mxu1 %v1071_v41  ;;  %v1109_v41 = vpack.c.bf16 %v763_v40, %v761_v39 }
 0x134   :  { %1074 = vmatpush1.bf16.msra.mxu1 %v1073_v50 }
 0x135   :  { %1076 = vmatprep.subr.bf16.mxu1 %v1075_v51 }
 0x138   :  { %1078 = vmatpush1.bf16.msra.mxu1 %v1077_v56 }
 0x139   :  { %1080 = vmatprep.subr.bf16.mxu1 %v1079_v57 }
 0x13c   :  { %1082 = vmatpush1.bf16.msra.mxu1 %v1081_v62  ;;  %v596_v62 = vrot.slane %v889_v55, %v1295_v45 }
 0x13d   :  { %1084 = vmatprep.subr.bf16.mxu1 %v1083_v63 }
 0x140   :  { %1086 = vmatpush1.bf16.msra.mxu1 %v1085_v5 }
 0x141   :  { %1088 = vmatprep.subr.bf16.mxu1 %v1087_v6  ;;  %v682_v6 = vrot.slane %v890_v61, %v1295_v45 }
 0x144   :  { %1090 = vmatpush1.bf16.msra.mxu1 %v1089_v11 }
 0x145   :  { %1092 = vmatprep.subr.bf16.mxu1 %v1091_v0  ;;  %v892_v0 = vld [vmem:[%s1358_s4 + $0x4] sm:$0x3] }
 0x146   :  { %v771_v12 = vrot.slane %v892_v0, %v1287_v43  ;;  %v775_v13 = vrot.slane %v892_v0, %v1295_v45 }
 0x148   :  { %1094 = vmatpush1.bf16.msra.mxu1 %v1093_v16 }
 0x149   :  { %1096 = vmatprep.subr.bf16.mxu1 %v1095_v17 }
 0x14c   :  { %1098 = vmatpush1.bf16.msra.mxu1 %v1097_v23 }
 0x14d   :  { %1100 = vmatprep.subr.bf16.mxu1 %v1099_v24 }
 0x150   :  { %1102 = vmatpush1.bf16.msra.mxu1 %v1101_v29 }
 0x151   :  { %1104 = vmatprep.subr.bf16.mxu1 %v1103_v31 }
 0x154   :  { %1106 = vmatpush1.bf16.msra.mxu1 %v1105_v36 }
 0x155   :  { %1108 = vmatprep.subr.bf16.mxu1 %v1107_v38 }
 0x158   :  { %1110 = vmatpush1.bf16.msra.mxu1 %v1109_v41 }
 0x15b   :  { %843 = vmatmul.mubr.f32.vlgmr.msra.gmra.mrb[2].mxu1 %v343_v42 }
 0x1ee   :  { %v487_v50 = vpop.f32.mrb[0].mxu1 }
 0x1ef   :  { %v488_v51 = vadd.f32 %v487_v50, %v414_v48  ;;  %v489_v52 = vpop.f32.mrb[1].mxu1 }
 0x1f0   :  { %v490_v53 = vadd.f32 %v489_v52, %v418_v44 }
 0x1f1   :  { %v492_v56 = vmax.f32 %v488_v51, 0.0 }
 0x1f2   :  { %v493_v57 = vmax.f32 %v490_v53, 0.0 }
 0x1f3   :  { %v506_v58 = vmul.f32 %v499_v25, %v492_v56 }
 0x1f4   :  { %v507_v60 = vmul.f32 %v503_v54, %v493_v57 }
 0x1f6   :  { %v508_v63 = vadd.f32 %v507_v60, %v506_v58  ;;  %v665_v1 = vpop.f32.mrb[6].mxu0 }
 0x1f7   :  { %v666_v2 = vadd.f32 %v665_v1, %v592_v59  ;;  %v667_v4 = vpop.f32.mrb[7].mxu0 }
 0x1f8   :  { %509 = vadd.xlane.f32.xlu0 %v508_v63  ;;  %v668_v5 = vadd.f32 %v667_v4, %v596_v62 }
 0x1f9   :  { %v670_v7 = vmax.f32 %v666_v2, 0.0 }
 0x1fa   :  { %v671_v8 = vmax.f32 %v668_v5, 0.0 }
 0x1fb   :  { %v685_v9 = vmul.f32 %v678_v3, %v670_v7 }
 0x1fc   :  { %v686_v10 = vmul.f32 %v682_v6, %v671_v8 }
 0x1fe   :  { %v687_v11 = vadd.f32 %v686_v10, %v685_v9 }
 0x200   :  { %688 = vadd.xlane.f32.xlu0 %v687_v11 }
 0x22e   :  { %v844_v15 = vpop.f32.mrb[2].mxu1 }
 0x22f   :  { %v845_v16 = vadd.f32 %v844_v15, %v771_v12  ;;  %v846_v17 = vpop.f32.mrb[3].mxu1 }
 0x230   :  { %v847_v19 = vadd.f32 %v846_v17, %v775_v13 }
 0x231   :  { %v849_v22 = vmax.f32 %v845_v16, 0.0 }
 0x232   :  { %v850_v23 = vmax.f32 %v847_v19, 0.0 }
 0x233   :  { %v864_v24 = vmul.f32 %v857_v18, %v849_v22 }
 0x234   :  { %v865_v20 = vmul.f32 %v861_v21, %v850_v23 }
 0x236   :  { %v866_v26 = vadd.f32 %v865_v20, %v864_v24 }
 0x238   :  { %867 = vadd.xlane.f32.xlu1 %v866_v26 }
 0x285   :  { %v510_v28 = vpop.xlane.xlu0 %509 }
 0x286   :  { %v518_v29 = vadd.f32 %v888_v27, %v510_v28 }
 0x288   :  { %520 = vst.msk [vmem:[%s1361_s7] sm:$0xff] %vm519_vm1, %v518_v29 }
 0x28d   :  { %v689_v43 = vpop.xlane.xlu0 %688 }
 0x28e   :  { %v697_v45 = vadd.f32 %v888_v27, %v689_v43 }
 0x290   :  { %699 = vst.msk [vmem:[%s1361_s7] sm:$0xff] %vm698_vm2, %v697_v45 }
 0x2c5   :  { %v868_v30 = vpop.xlane.xlu1 %867 }
 0x2c6   :  { %v876_v31 = vadd.f32 %v888_v27, %v868_v30 }
 0x2c8   :  { %878 = vst.msk [vmem:[%s1361_s7] sm:$0xff] %vm877_vm3, %v876_v31 }
 0x2c9   :  { %883 = vsyncpa [#allocation3], 1 }
 0x2ca   :  { %884 = vsyncpa [#allocation5], 1 }

</bundles_post_ra>
